<compile_context>
chip_gen: v5e
topology: v5e:2x2
jax: 0.10.0
libtpu: 0.0.40
codegen_flags: <defaults>
</compile_context>

<pallas_src>
import jax
import jax.numpy as jnp
from jax.experimental import pallas as pl
from jax.experimental.pallas import tpu as pltpu

N_IN = 2
N_HIDDEN = 5

# Packed parameter layout (21 f32 scalars, resident in SMEM):
#   [0:10)  w1  as [in=2, out=5] row-major  (i.e. PyTorch linear1.weight.T)
#   [10:15) b1
#   [15:20) w2  as [in=5]                    (PyTorch linear2.weight.T squeezed)
#   [20]    b2
P_W1 = 0
P_B1 = N_IN * N_HIDDEN          # 10
P_W2 = P_B1 + N_HIDDEN          # 15
P_B2 = P_W2 + N_HIDDEN          # 20
N_PARAMS = P_B2 + 1             # 21


def mlp_kernel(params_ref, x_ref, o_ref):
    # params_ref: [21] f32 in SMEM (scalar reads)
    # x_ref:      [2, TB] f32 in VMEM, batch on lanes
    # o_ref:      [1, TB] f32 in VMEM, lane-dense output
    x0 = x_ref[0:1, :]          # x[:, 0] laid on lanes -> [1, TB]
    x1 = x_ref[1:2, :]          # x[:, 1] laid on lanes -> [1, TB]

    y = jnp.zeros_like(x0)
    # Fully unrolled at trace time: 5 hidden units, pure VPU FMAs + ReLU select,
    # weights/biases broadcast from SMEM scalars (no MXU, no cross-lane reduce).
    for j in range(N_HIDDEN):
        h_j = (x0 * params_ref[P_W1 + j]
               + x1 * params_ref[P_W1 + N_HIDDEN + j]
               + params_ref[P_B1 + j])
        h_j = jnp.maximum(h_j, 0.0)               # ReLU
        y = y + h_j * params_ref[P_W2 + j]
    o_ref[...] = y + params_ref[P_B2]


def mlp_forward(x, w1, b1, w2, b2, *, tile_b=1024):
    """x: [B, 2] f32; w1: [2,5] (weight.T); b1: [5]; w2: [5,1] (weight.T); b2: [1].
    Returns [B, 1] f32, matching Linear(2,5) -> ReLU -> Linear(5,1)."""
    B = x.shape[0]

    params = jnp.concatenate([
        w1.reshape(-1).astype(jnp.float32),
        b1.reshape(-1).astype(jnp.float32),
        w2.reshape(-1).astype(jnp.float32),
        b2.reshape(-1).astype(jnp.float32),
    ])
    assert params.shape == (N_PARAMS,)

    # Layout plumbing in the wrapper: batch on the lane axis.
    xt = x.astype(jnp.float32).T                    # [2, B]

    if B <= tile_b:
        tb, Bp = B, B                               # single fat tile (block == full dim)
    else:
        tb = tile_b                                 # multiple of 128 -> unmasked stores
        Bp = pl.cdiv(B, tb) * tb
        if Bp != B:
            xt = jnp.pad(xt, ((0, 0), (0, Bp - B)))

    out = pl.pallas_call(
        mlp_kernel,
        out_shape=jax.ShapeDtypeStruct((1, Bp), jnp.float32),
        grid=(Bp // tb,),
        in_specs=[
            # 21 scalars: one untiled SMEM resident, no padded VMEM DMAs.
            pl.BlockSpec(memory_space=pltpu.MemorySpace.SMEM),
            pl.BlockSpec((N_IN, tb), lambda i: (0, i)),
        ],
        out_specs=pl.BlockSpec((1, tb), lambda i: (0, i)),
        compiler_params=pltpu.CompilerParams(
            dimension_semantics=("parallel",)),     # batch tiles split across TCs on v7x
    )(params, xt)

    return out[:, :B].T                             # back to [B, 1]


def init_params(key):
    # Deterministic init mimicking nn.Linear's uniform(-1/sqrt(fan_in), 1/sqrt(fan_in)).
    k1, k2, k3, k4 = jax.random.split(key, 4)
    bound1 = 1.0 / jnp.sqrt(2.0)
    bound2 = 1.0 / jnp.sqrt(5.0)
    w1 = jax.random.uniform(k1, (2, 5), jnp.float32, -bound1, bound1)   # linear1.weight.T
    b1 = jax.random.uniform(k2, (5,),   jnp.float32, -bound1, bound1)
    w2 = jax.random.uniform(k3, (5, 1), jnp.float32, -bound2, bound2)   # linear2.weight.T
    b2 = jax.random.uniform(k4, (1,),   jnp.float32, -bound2, bound2)
    return w1, b1, w2, b2


def _reference(x, w1, b1, w2, b2):
    return jnp.maximum(x @ w1 + b1, 0.0) @ w2 + b2


if __name__ == "__main__":
    key = jax.random.PRNGKey(0)
    kx, kp, kx2 = jax.random.split(key, 3)
    w1, b1, w2, b2 = init_params(kp)

    # Small-batch check (single tile, block == full array).
    batch = 8
    x = jax.random.normal(kx, (batch, N_IN), jnp.float32)
    out = mlp_forward(x, w1, b1, w2, b2)
    jax.block_until_ready(out)
    ref = _reference(x, w1, b1, w2, b2)
    assert out.shape == (batch, 1)
    assert jnp.allclose(out, ref, atol=1e-5, rtol=1e-5)

    # Larger-batch check exercising the padded, parallel batch grid.
    batch2 = 2085
    x2 = jax.random.normal(kx2, (batch2, N_IN), jnp.float32)
    out2 = mlp_forward(x2, w1, b1, w2, b2, tile_b=1024)
    jax.block_until_ready(out2)
    ref2 = _reference(x2, w1, b1, w2, b2)
    assert out2.shape == (batch2, 1)
    assert jnp.allclose(out2, ref2, atol=1e-5, rtol=1e-5)

    print("KERNEL_OK")
</pallas_src>

<mosaic_0001>
module attributes {stable_mosaic.version = 11 : i64} {
  func.func @mlp_kernel(%arg0: i32, %arg1: memref<21xf32, #tpu.memory_space<smem>>, %arg2: memref<2x8xf32, #tpu.memory_space<vmem>>, %arg3: memref<1x8xf32, #tpu.memory_space<vmem>>) attributes {dimension_semantics = [#tpu.dimension_semantics<parallel>], iteration_bounds = array<i64: 1>, scalar_prefetch = 0 : i64, scratch_operands = 0 : i64, tpu.core_type = #tpu.core_type<tc>, window_params = [{transform_indices = @transform_0, window_bounds = array<i64: 21>}, {transform_indices = @transform_1, window_bounds = array<i64: 2, 8>}, {transform_indices = @transform_2, window_bounds = array<i64: 1, 8>}]} {
    %c0 = arith.constant 0 : index
    %c0_0 = arith.constant 0 : index
    %0 = vector.load %arg2[%c0, %c0_0] : memref<2x8xf32, #tpu.memory_space<vmem>>, vector<1x8xf32>
    %c1 = arith.constant 1 : index
    %c0_1 = arith.constant 0 : index
    %1 = vector.load %arg2[%c1, %c0_1] : memref<2x8xf32, #tpu.memory_space<vmem>>, vector<1x8xf32>
    %cst = arith.constant 0.000000e+00 : f32
    %2 = vector.broadcast %cst : f32 to vector<1x8xf32>
    %c0_2 = arith.constant 0 : index
    %3 = memref.load %arg1[%c0_2] : memref<21xf32, #tpu.memory_space<smem>>
    %4 = vector.broadcast %3 : f32 to vector<1x8xf32>
    %5 = arith.mulf %0, %4 : vector<1x8xf32>
    %c5 = arith.constant 5 : index
    %6 = memref.load %arg1[%c5] : memref<21xf32, #tpu.memory_space<smem>>
    %7 = vector.broadcast %6 : f32 to vector<1x8xf32>
    %8 = arith.mulf %1, %7 : vector<1x8xf32>
    %9 = arith.addf %5, %8 : vector<1x8xf32>
    %c10 = arith.constant 10 : index
    %10 = memref.load %arg1[%c10] : memref<21xf32, #tpu.memory_space<smem>>
    %11 = vector.broadcast %10 : f32 to vector<1x8xf32>
    %12 = arith.addf %9, %11 : vector<1x8xf32>
    %cst_3 = arith.constant 0.000000e+00 : f32
    %13 = vector.broadcast %cst_3 : f32 to vector<1x8xf32>
    %14 = arith.maximumf %12, %13 : vector<1x8xf32>
    %c15 = arith.constant 15 : index
    %15 = memref.load %arg1[%c15] : memref<21xf32, #tpu.memory_space<smem>>
    %16 = vector.broadcast %15 : f32 to vector<1x8xf32>
    %17 = arith.mulf %14, %16 : vector<1x8xf32>
    %18 = arith.addf %2, %17 : vector<1x8xf32>
    %c1_4 = arith.constant 1 : index
    %19 = memref.load %arg1[%c1_4] : memref<21xf32, #tpu.memory_space<smem>>
    %20 = vector.broadcast %19 : f32 to vector<1x8xf32>
    %21 = arith.mulf %0, %20 : vector<1x8xf32>
    %c6 = arith.constant 6 : index
    %22 = memref.load %arg1[%c6] : memref<21xf32, #tpu.memory_space<smem>>
    %23 = vector.broadcast %22 : f32 to vector<1x8xf32>
    %24 = arith.mulf %1, %23 : vector<1x8xf32>
    %25 = arith.addf %21, %24 : vector<1x8xf32>
    %c11 = arith.constant 11 : index
    %26 = memref.load %arg1[%c11] : memref<21xf32, #tpu.memory_space<smem>>
    %27 = vector.broadcast %26 : f32 to vector<1x8xf32>
    %28 = arith.addf %25, %27 : vector<1x8xf32>
    %cst_5 = arith.constant 0.000000e+00 : f32
    %29 = vector.broadcast %cst_5 : f32 to vector<1x8xf32>
    %30 = arith.maximumf %28, %29 : vector<1x8xf32>
    %c16 = arith.constant 16 : index
    %31 = memref.load %arg1[%c16] : memref<21xf32, #tpu.memory_space<smem>>
    %32 = vector.broadcast %31 : f32 to vector<1x8xf32>
    %33 = arith.mulf %30, %32 : vector<1x8xf32>
    %34 = arith.addf %18, %33 : vector<1x8xf32>
    %c2 = arith.constant 2 : index
    %35 = memref.load %arg1[%c2] : memref<21xf32, #tpu.memory_space<smem>>
    %36 = vector.broadcast %35 : f32 to vector<1x8xf32>
    %37 = arith.mulf %0, %36 : vector<1x8xf32>
    %c7 = arith.constant 7 : index
    %38 = memref.load %arg1[%c7] : memref<21xf32, #tpu.memory_space<smem>>
    %39 = vector.broadcast %38 : f32 to vector<1x8xf32>
    %40 = arith.mulf %1, %39 : vector<1x8xf32>
    %41 = arith.addf %37, %40 : vector<1x8xf32>
    %c12 = arith.constant 12 : index
    %42 = memref.load %arg1[%c12] : memref<21xf32, #tpu.memory_space<smem>>
    %43 = vector.broadcast %42 : f32 to vector<1x8xf32>
    %44 = arith.addf %41, %43 : vector<1x8xf32>
    %cst_6 = arith.constant 0.000000e+00 : f32
    %45 = vector.broadcast %cst_6 : f32 to vector<1x8xf32>
    %46 = arith.maximumf %44, %45 : vector<1x8xf32>
    %c17 = arith.constant 17 : index
    %47 = memref.load %arg1[%c17] : memref<21xf32, #tpu.memory_space<smem>>
    %48 = vector.broadcast %47 : f32 to vector<1x8xf32>
    %49 = arith.mulf %46, %48 : vector<1x8xf32>
    %50 = arith.addf %34, %49 : vector<1x8xf32>
    %c3 = arith.constant 3 : index
    %51 = memref.load %arg1[%c3] : memref<21xf32, #tpu.memory_space<smem>>
    %52 = vector.broadcast %51 : f32 to vector<1x8xf32>
    %53 = arith.mulf %0, %52 : vector<1x8xf32>
    %c8 = arith.constant 8 : index
    %54 = memref.load %arg1[%c8] : memref<21xf32, #tpu.memory_space<smem>>
    %55 = vector.broadcast %54 : f32 to vector<1x8xf32>
    %56 = arith.mulf %1, %55 : vector<1x8xf32>
    %57 = arith.addf %53, %56 : vector<1x8xf32>
    %c13 = arith.constant 13 : index
    %58 = memref.load %arg1[%c13] : memref<21xf32, #tpu.memory_space<smem>>
    %59 = vector.broadcast %58 : f32 to vector<1x8xf32>
    %60 = arith.addf %57, %59 : vector<1x8xf32>
    %cst_7 = arith.constant 0.000000e+00 : f32
    %61 = vector.broadcast %cst_7 : f32 to vector<1x8xf32>
    %62 = arith.maximumf %60, %61 : vector<1x8xf32>
    %c18 = arith.constant 18 : index
    %63 = memref.load %arg1[%c18] : memref<21xf32, #tpu.memory_space<smem>>
    %64 = vector.broadcast %63 : f32 to vector<1x8xf32>
    %65 = arith.mulf %62, %64 : vector<1x8xf32>
    %66 = arith.addf %50, %65 : vector<1x8xf32>
    %c4 = arith.constant 4 : index
    %67 = memref.load %arg1[%c4] : memref<21xf32, #tpu.memory_space<smem>>
    %68 = vector.broadcast %67 : f32 to vector<1x8xf32>
    %69 = arith.mulf %0, %68 : vector<1x8xf32>
    %c9 = arith.constant 9 : index
    %70 = memref.load %arg1[%c9] : memref<21xf32, #tpu.memory_space<smem>>
    %71 = vector.broadcast %70 : f32 to vector<1x8xf32>
    %72 = arith.mulf %1, %71 : vector<1x8xf32>
    %73 = arith.addf %69, %72 : vector<1x8xf32>
    %c14 = arith.constant 14 : index
    %74 = memref.load %arg1[%c14] : memref<21xf32, #tpu.memory_space<smem>>
    %75 = vector.broadcast %74 : f32 to vector<1x8xf32>
    %76 = arith.addf %73, %75 : vector<1x8xf32>
    %cst_8 = arith.constant 0.000000e+00 : f32
    %77 = vector.broadcast %cst_8 : f32 to vector<1x8xf32>
    %78 = arith.maximumf %76, %77 : vector<1x8xf32>
    %c19 = arith.constant 19 : index
    %79 = memref.load %arg1[%c19] : memref<21xf32, #tpu.memory_space<smem>>
    %80 = vector.broadcast %79 : f32 to vector<1x8xf32>
    %81 = arith.mulf %78, %80 : vector<1x8xf32>
    %82 = arith.addf %66, %81 : vector<1x8xf32>
    %c20 = arith.constant 20 : index
    %83 = memref.load %arg1[%c20] : memref<21xf32, #tpu.memory_space<smem>>
    %84 = vector.broadcast %83 : f32 to vector<1x8xf32>
    %85 = arith.addf %82, %84 : vector<1x8xf32>
    %c0_9 = arith.constant 0 : index
    %c0_10 = arith.constant 0 : index
    %86 = vector.load %arg3[%c0_9, %c0_10] : memref<1x8xf32, #tpu.memory_space<vmem>>, vector<1x8xf32>
    tpu.vector_store %arg3[%c0_9, %c0_10], %85 {strides = array<i32>} : memref<1x8xf32, #tpu.memory_space<vmem>>, vector<1x8xf32>,
    return
  }
  func.func @transform_0(%arg0: i32) -> i32 {
    %c0_i32 = arith.constant 0 : i32
    %c0_i32_0 = arith.constant 0 : i32
    return %c0_i32 : i32
  }
  func.func @transform_1(%arg0: i32) -> (i32, i32) {
    %c0_i32 = arith.constant 0 : i32
    %c0_i32_0 = arith.constant 0 : i32
    return %c0_i32, %arg0 : i32, i32
  }
  func.func @transform_2(%arg0: i32) -> (i32, i32) {
    %c0_i32 = arith.constant 0 : i32
    %c0_i32_0 = arith.constant 0 : i32
    return %c0_i32, %arg0 : i32, i32
  }
}

</mosaic_0001>

<bundles_post_ra>
// kernel: tpu_custom_call.1
= control target key start
LH: loop header
LB: loop body
LE: loop exit
PB: predicated region body
PF: predicated region fallthrough
CT: control target
= control target key end

     0   :  { %7 = vsyncpa [#allocation5], 0  ;;  %s273_s0 = inlined_call_operand.hbm [shape: f32[21], index: 0, kind: input, shape index: {}]   ;;  %s274_s1 = inlined_call_operand.hbm [shape: f32[2,8], index: 1, kind: input, shape index: {}]   ;;  %s275_s2 = inlined_call_operand.hbm [shape: f32[1,8], index: 2, kind: output, shape index: {}]  }
   0x1   :  { %8 = vsyncpa [#allocation3], 0 }
   0x2   :  { %9 = vsyncpa [#allocation4], 0  ;;  %s15_s11 = sshll.u32 %s273_s0, 4  ;;  %s24_s14 = sshll.u32 %s274_s1, 4  ;;  %s16_s11 = int_to_ptr.hbm [resolvable:$true] %s15_s11  ;;  %s25_s14 = int_to_ptr.hbm [resolvable:$true] %s24_s14 }
   0x3   :  { %s228_s15 = smov [#allocation2]   ;;  %s229_s16 = smov [#allocation6]  }
   0x4   :  { %18 = dma.hbm_to_smem %s16_s11, 16, %s228_s15, [#allocation5]  }
   0x5   :  { %s26_s17 = sshll.u32 %s229_s16, 4  ;;  %s27_s17 = int_to_ptr.vmem [resolvable:$true] %s26_s17 }
   0x6   :  { %29 = dma.hbm_to_vmem [thread:$0]  %s25_s14, 32, %s27_s17, [#allocation3]  }
   0x7   :  { %222 = dma.done.wait [#allocation5], 16  }
   0x8   :  { %223 = vsyncadd [#allocation5], 4294967280 }
   0x9   :  { %224 = dma.done.wait [#allocation3], 32  }
   0xa   :  { %225 = vsyncadd [#allocation3], 4294967264 }
   0xb   :  { %38 = sfence }
   0xc   :  { %s41_s18 = sld [smem:[#allocation2]]  ;;  %v39_v0 = vld [vmem:[#allocation6] sm:$0x1]  ;;  %v40_v1 = vld [vmem:[#allocation6 + $0x1] sm:$0x1]  ;;  %s230_s9 = smov [#allocation7]  }
   0xd   :  { %s139_s19 = sld [smem:[#allocation2 + $0x5]]  ;;  %s126_s10 = sshll.u32 %s230_s9, 4  ;;  %vm119_vm0 = vcmask 57344   ;;  %s127_s10 = int_to_ptr.vmem [resolvable:$true] %s126_s10 }
   0xe   :  { %s140_s0 = sld [smem:[#allocation2 + $0xa]]  ;;  %s128_s13 = sshll.u32 %s275_s2, 4  ;;  %s129_s13 = int_to_ptr.hbm [resolvable:$true] %s128_s13 }
   0xf   :  { %s252_s20 = sld [smem:[#allocation2 + $0xf]] }
  0x10   :  { %s142_s21 = sld [smem:[#allocation2 + $0x1]] }
  0x11   :  { %s143_s1 = sld [smem:[#allocation2 + $0x6]] }
  0x12   :  { %v42_v2 = vstv %s41_s18  ;;  %s144_s22 = sld [smem:[#allocation2 + $0xb]] }
  0x13   :  { %v43_v3 = vmul.f32 %v42_v2, %v39_v0  ;;  %v45_v4 = vstv %s139_s19  ;;  %s254_s23 = sld [smem:[#allocation2 + $0x10]] }
  0x14   :  { %v46_v5 = vmul.f32 %v45_v4, %v40_v1  ;;  %s146_s24 = sld [smem:[#allocation2 + $0x2]]  ;;  %v49_v6 = vstv %s140_s0 }
  0x15   :  { %s147_s25 = sld [smem:[#allocation2 + $0x7]]  ;;  %v53_v17 = vstv %s252_s20 }
  0x16   :  { %v47_v7 = vadd.f32 %v46_v5, %v43_v3  ;;  %v57_v8 = vstv %s142_s21  ;;  %s256_s26 = sld [smem:[#allocation2 + $0xc]] }
  0x17   :  { %v58_v9 = vmul.f32 %v57_v8, %v39_v0  ;;  %v60_v10 = vstv %s143_s1  ;;  %s258_s27 = sld [smem:[#allocation2 + $0x11]] }
  0x18   :  { %v50_v11 = vadd.f32 %v49_v6, %v47_v7  ;;  %v61_v12 = vmul.f32 %v60_v10, %v40_v1  ;;  %s150_s28 = sld [smem:[#allocation2 + $0x3]]  ;;  %v64_v13 = vstv %s144_s22 }
  0x19   :  { %s151_s29 = sld [smem:[#allocation2 + $0x8]]  ;;  %v68_v22 = vstv %s254_s23 }
  0x1a   :  { %v51_v14 = vmax.f32 %v50_v11, 0.0  ;;  %v62_v15 = vadd.f32 %v61_v12, %v58_v9  ;;  %v72_v16 = vstv %s146_s24  ;;  %s260_s30 = sld [smem:[#allocation2 + $0xd]] }
  0x1b   :  { %v73_v18 = vmul.f32 %v72_v16, %v39_v0  ;;  %v75_v19 = vstv %s147_s25  ;;  %s263_s3 = sld [smem:[#allocation2 + $0x12]] }
  0x1c   :  { %v65_v20 = vadd.f32 %v64_v13, %v62_v15  ;;  %v76_v21 = vmul.f32 %v75_v19, %v40_v1  ;;  %s154_s4 = sld [smem:[#allocation2 + $0x4]]  ;;  %v79_v23 = vstv %s256_s26  ;;  %v54_v24 = vmul.f32 %v53_v17, %v51_v14 }
  0x1d   :  { %s155_s5 = sld [smem:[#allocation2 + $0x9]]  ;;  %v83_v33 = vstv %s258_s27 }
  0x1e   :  { %v66_v25 = vmax.f32 %v65_v20, 0.0  ;;  %v77_v26 = vadd.f32 %v76_v21, %v73_v18  ;;  %v87_v27 = vstv %s150_s28  ;;  %s156_s6 = sld [smem:[#allocation2 + $0xe]] }
  0x1f   :  { %v88_v28 = vmul.f32 %v87_v27, %v39_v0  ;;  %v90_v29 = vstv %s151_s29  ;;  %s157_s7 = sld [smem:[#allocation2 + $0x13]] }
  0x20   :  { %v69_v30 = vmul.f32 %v68_v22, %v66_v25  ;;  %v80_v31 = vadd.f32 %v79_v23, %v77_v26  ;;  %v91_v32 = vmul.f32 %v90_v29, %v40_v1  ;;  %v94_v34 = vstv %s260_s30  ;;  %s158_s8 = sld [smem:[#allocation2 + $0x14]] }
  0x21   :  { %v98_v44 = vstv %s263_s3 }
  0x22   :  { %v70_v35 = vadd.f32 %v69_v30, %v54_v24  ;;  %v81_v36 = vmax.f32 %v80_v31, 0.0  ;;  %v92_v37 = vadd.f32 %v91_v32, %v88_v28  ;;  %v102_v38 = vstv %s154_s4 }
  0x23   :  { %v103_v39 = vmul.f32 %v102_v38, %v39_v0  ;;  %v105_v40 = vstv %s155_s5 }
  0x24   :  { %v84_v41 = vmul.f32 %v83_v33, %v81_v36  ;;  %v95_v42 = vadd.f32 %v94_v34, %v92_v37  ;;  %v106_v43 = vmul.f32 %v105_v40, %v40_v1  ;;  %v109_v45 = vstv %s156_s6 }
  0x25   :  { %v113_v51 = vstv %s157_s7 }
  0x26   :  { %v85_v46 = vadd.f32 %v84_v41, %v70_v35  ;;  %v96_v47 = vmax.f32 %v95_v42, 0.0  ;;  %v107_v48 = vadd.f32 %v106_v43, %v103_v39  ;;  %v117_v55 = vstv %s158_s8 }
  0x28   :  { %v99_v49 = vmul.f32 %v98_v44, %v96_v47  ;;  %v110_v50 = vadd.f32 %v109_v45, %v107_v48 }
  0x2a   :  { %v100_v52 = vadd.f32 %v99_v49, %v85_v46  ;;  %v111_v53 = vmax.f32 %v110_v50, 0.0 }
  0x2c   :  { %v114_v54 = vmul.f32 %v113_v51, %v111_v53 }
  0x2e   :  { %v115_v56 = vadd.f32 %v114_v54, %v100_v52 }
  0x30   :  { %v118_v57 = vadd.f32 %v117_v55, %v115_v56 }
  0x32   :  { %120 = vst.msk [vmem:[#allocation7] sm:$0x1] %vm119_vm0, %v118_v57 }
  0x33   :  { %131 = dma.vmem_to_hbm [thread:$0]  %s127_s10, 16, %s129_s13, [#allocation4]  }
  0x34   :  { %226 = dma.done.wait [#allocation4], 16  }
  0x35   :  { %227 = vsyncadd [#allocation4], 4294967280 }
  0x36   :  { %136 = vsyncpa [#allocation3], 1 }
  0x37   :  { %137 = vsyncpa [#allocation4], 1 }
  0x38   :  { %138 = vsyncpa [#allocation5], 1 }

</bundles_post_ra>
